<compile_context>
chip_gen: v5e
topology: v5e:2x2
jax: 0.10.0
libtpu: 0.0.40
codegen_flags: <defaults>
</compile_context>

<pallas_src>
import functools
import math

import jax
import jax.numpy as jnp
from jax import lax
from jax.experimental import pallas as pl
from jax.experimental.pallas import tpu as pltpu

# ArcMarginLoss hyper-parameters (match PyTorch defaults)
S = 30.0
M = 0.5
EASY_MARGIN = False
EPS = 1e-08
COS_M = math.cos(M)
SIN_M = math.sin(M)
TH = math.cos(math.pi - M)
MM = math.sin(math.pi - M) * M

NEG_BIG = -1.0e30  # plain Python float (NOT a jnp scalar -> no captured const);
                   # NaN-safe "-inf" stand-in (exp underflows to 0)


def _round_up(x, m):
    return (x + m - 1) // m * m


def _arc_margin_kernel(
    x_ref,       # (Ntile, D)   bf16  pre-normalized input rows
    w_ref,       # (Ctile, D)   bf16  pre-normalized weight rows (1/||w|| folded in)
    bias_ref,    # (1, Ctile)   f32   additive class-padding mask (0 real / -1e30 pad)
    t_ref,       # (Ntile, 1)   int32 targets
    out_ref,     # (Ntile, 128) f32   per-row loss broadcast across lanes
    m_scr,       # (Ntile, 1)   f32   running max of scaled logits
    l_scr,       # (Ntile, 1)   f32   running sum of exp(logit - m)
    tl_scr,      # (Ntile, 1)   f32   target logit (S * phi_target)
    *,
    c_tile,
    mask_classes,
    easy_margin,
):
    c_idx = pl.program_id(1)
    n_c = pl.num_programs(1)

    # ---- init online-softmax accumulators (once per N tile) -------------------
    @pl.when(c_idx == 0)
    def _init():
        m_scr[...] = jnp.full(m_scr.shape, NEG_BIG, m_scr.dtype)
        l_scr[...] = jnp.zeros(l_scr.shape, l_scr.dtype)
        tl_scr[...] = jnp.zeros(tl_scr.shape, tl_scr.dtype)

    # ---- cosine similarity: bf16 MXU matmul, f32 accumulation -----------------
    # Contract on D (x @ w.T, flash-attention q.kT pattern) -> no wrapper
    # transpose of the weight matrix.
    cosine = lax.dot_general(
        x_ref[...], w_ref[...],
        dimension_numbers=(((1,), (1,)), ((), ())),
        preferred_element_type=jnp.float32,
    )                                                              # (Ntile, Ctile)

    # ---- arc margin only at the target column (O(Ntile) extra work) -----------
    t = t_ref[...]                                                 # (Ntile, 1)
    c_base = c_idx * c_tile
    # per-row scalar: is this row's target inside this C tile?
    hit = jnp.logical_and(t >= c_base, t < c_base + c_tile).astype(jnp.float32)
    col = lax.broadcasted_iota(jnp.int32, cosine.shape, 1)
    is_t = col == (t - c_base)                                     # (Ntile, Ctile)

    cos_t = jnp.sum(jnp.where(is_t, cosine, 0.0), axis=1, keepdims=True)
    sin_t = jnp.sqrt(jnp.clip(1.0 - cos_t * cos_t, 0.0, 1.0))
    phi_t = cos_t * COS_M - sin_t * SIN_M
    if easy_margin:
        phi_t = jnp.where(cos_t > 0.0, phi_t, cos_t)
    else:
        phi_t = jnp.where(cos_t > TH, phi_t, cos_t - MM)
    tl_scr[...] += hit * (S * phi_t)

    # ---- scaled logits: fused one-hot mix as a single select ------------------
    logits = S * jnp.where(is_t, phi_t, cosine)
    if mask_classes:
        logits = logits + bias_ref[...]          # 0 for real classes, -1e30 for padding

    # ---- online softmax accumulation over C tiles ------------------------------
    m_prev = m_scr[...]
    m_new = jnp.maximum(m_prev, jnp.max(logits, axis=1, keepdims=True))
    l_scr[...] = l_scr[...] * jnp.exp(m_prev - m_new) + jnp.sum(
        jnp.exp(logits - m_new), axis=1, keepdims=True
    )
    m_scr[...] = m_new

    # ---- finalize: per-row CE loss, written once per N tile (lane-dense) ------
    @pl.when(c_idx == n_c - 1)
    def _finalize():
        lse = m_scr[...] + jnp.log(l_scr[...])
        out_ref[...] = jnp.broadcast_to(lse - tl_scr[...], out_ref.shape)


def arc_margin_loss(inputs, targets, fc_weights, *, n_tile=256, c_tile=512):
    """inputs: (N, D), targets: (N,) int, fc_weights: (C, D) -> scalar f32 loss."""
    N, D = inputs.shape
    C, D2 = fc_weights.shape
    assert D == D2, (D, D2)

    # ---- tile selection --------------------------------------------------------
    n_tile = min(n_tile, _round_up(N, 8))
    # keep >= 2 N tiles when possible so the "parallel" axis shards across the
    # two v7x TensorCores (no-op on v5e/v6e single-TC chips).
    if N >= 16 and _round_up(N, n_tile) // n_tile < 2:
        n_tile = _round_up((N + 1) // 2, 8)
    c_tile = min(c_tile, _round_up(C, 128))
    n_pad = _round_up(N, n_tile)
    c_pad = _round_up(C, c_tile)

    x32 = inputs.astype(jnp.float32)
    w32 = fc_weights.astype(jnp.float32)

    # Fold the inverse norms into the operands (single wrapper pass, fused with
    # the bf16 cast). Padded rows are zero -> normalized rows stay zero.
    inv_x = lax.rsqrt(jnp.maximum(jnp.sum(x32 * x32, axis=1, keepdims=True), EPS * EPS))
    inv_w = lax.rsqrt(jnp.maximum(jnp.sum(w32 * w32, axis=1, keepdims=True), EPS * EPS))
    xn = (x32 * inv_x).astype(jnp.bfloat16)
    wn = (w32 * inv_w).astype(jnp.bfloat16)

    x = jnp.zeros((n_pad, D), jnp.bfloat16).at[:N].set(xn)
    w = jnp.zeros((c_pad, D), jnp.bfloat16).at[:C].set(wn)     # NO transpose

    mask_classes = c_pad != C
    # Additive padding mask row: 0 for real classes, -1e30 for padded columns.
    bias = jnp.where(jnp.arange(c_pad) < C, 0.0, NEG_BIG).astype(jnp.float32)[None, :]
    t2d = jnp.zeros((n_pad, 1), jnp.int32).at[:N, 0].set(targets.astype(jnp.int32))

    grid = (n_pad // n_tile, c_pad // c_tile)
    kernel = functools.partial(
        _arc_margin_kernel,
        c_tile=c_tile,
        mask_classes=mask_classes,
        easy_margin=EASY_MARGIN,
    )

    per_row = pl.pallas_call(
        kernel,
        out_shape=jax.ShapeDtypeStruct((n_pad, 128), jnp.float32),
        grid_spec=pltpu.PrefetchScalarGridSpec(
            num_scalar_prefetch=0,
            grid=grid,
            in_specs=[
                pl.BlockSpec((n_tile, D), lambda i, j: (i, 0)),   # x (normalized, bf16)
                pl.BlockSpec((c_tile, D), lambda i, j: (j, 0)),   # w (normalized, bf16)
                pl.BlockSpec((1, c_tile), lambda i, j: (0, j)),   # padding bias row
                pl.BlockSpec((n_tile, 1), lambda i, j: (i, 0)),   # targets
            ],
            out_specs=pl.BlockSpec((n_tile, 128), lambda i, j: (i, 0)),
            scratch_shapes=[
                pltpu.VMEM((n_tile, 1), jnp.float32),  # running max
                pltpu.VMEM((n_tile, 1), jnp.float32),  # running sum-exp
                pltpu.VMEM((n_tile, 1), jnp.float32),  # target logit
            ],
        ),
        compiler_params=pltpu.CompilerParams(
            dimension_semantics=("parallel", "arbitrary"),
            vmem_limit_bytes=48 * 1024 * 1024,  # safe on v7x (64 MiB) and v5e/v6e
        ),
    )(x, w, bias, t2d)

    # Mean over the TRUE batch size (padded rows dropped here).
    return jnp.sum(per_row[:N, 0]) / N


def _reference(inputs, targets, fc_weights):
    # Pure-JAX f32 reference mirroring the PyTorch module.
    ip = inputs @ fc_weights.T
    w1 = jnp.linalg.norm(inputs, axis=1)
    w2 = jnp.linalg.norm(fc_weights, axis=1)
    cosine = ip / jnp.maximum(jnp.outer(w1, w2), EPS)
    sine = jnp.sqrt(jnp.clip(1.0 - cosine**2, 0.0, 1.0))
    phi = cosine * COS_M - sine * SIN_M
    if EASY_MARGIN:
        phi = jnp.where(cosine > 0.0, phi, cosine)
    else:
        phi = jnp.where(cosine > TH, phi, cosine - MM)
    one_hot = jax.nn.one_hot(targets, cosine.shape[1], dtype=cosine.dtype)
    logits = S * (one_hot * phi + (1.0 - one_hot) * cosine)
    logp = jax.nn.log_softmax(logits, axis=1)
    return -jnp.mean(jnp.sum(one_hot * logp, axis=1))


if __name__ == "__main__":
    key = jax.random.PRNGKey(0)

    # --- test 1: small shapes (single-tile grid, padded C) ----------------------
    k1, k2, k3 = jax.random.split(key, 3)
    N, D, C = 8, 32, 16
    inputs = jax.random.normal(k1, (N, D), dtype=jnp.float32)
    fc_weights = jax.random.normal(k2, (C, D), dtype=jnp.float32)
    targets = jax.random.randint(k3, (N,), 0, C, dtype=jnp.int32)

    loss = jax.block_until_ready(arc_margin_loss(inputs, targets, fc_weights))
    ref = _reference(inputs, targets, fc_weights)
    # bf16 operands (f32 accumulation) -> looser tolerance vs the f32 reference.
    assert jnp.allclose(loss, ref, atol=5e-2, rtol=2e-2), (loss, ref)

    # --- test 2: multi-tile grid with N and C padding ----------------------------
    k4, k5, k6 = jax.random.split(jax.random.fold_in(key, 1), 3)
    N2, D2, C2 = 200, 64, 300
    inputs2 = jax.random.normal(k4, (N2, D2), dtype=jnp.float32)
    fc_weights2 = jax.random.normal(k5, (C2, D2), dtype=jnp.float32)
    targets2 = jax.random.randint(k6, (N2,), 0, C2, dtype=jnp.int32)

    loss2 = jax.block_until_ready(
        arc_margin_loss(inputs2, targets2, fc_weights2, n_tile=256, c_tile=128)
    )
    ref2 = _reference(inputs2, targets2, fc_weights2)
    assert jnp.allclose(loss2, ref2, atol=5e-2, rtol=2e-2), (loss2, ref2)

    print("KERNEL_OK")
</pallas_src>

<mosaic_0001>
module attributes {stable_mosaic.version = 11 : i64} {
  func.func @_arc_margin_kernel(%arg0: i32, %arg1: i32, %arg2: memref<8x32xbf16, #tpu.memory_space<vmem>>, %arg3: memref<128x32xbf16, #tpu.memory_space<vmem>>, %arg4: memref<1x128xf32, #tpu.memory_space<vmem>>, %arg5: memref<8x1xi32, #tpu.memory_space<vmem>>, %arg6: memref<8x128xf32, #tpu.memory_space<vmem>>, %arg7: memref<8x1xf32, #tpu.memory_space<vmem>>, %arg8: memref<8x1xf32, #tpu.memory_space<vmem>>, %arg9: memref<8x1xf32, #tpu.memory_space<vmem>>) attributes {dimension_semantics = [#tpu.dimension_semantics<parallel>, #tpu.dimension_semantics<arbitrary>], iteration_bounds = array<i64: 1, 1>, scalar_prefetch = 0 : i64, scratch_operands = 3 : i64, tpu.core_type = #tpu.core_type<tc>, window_params = [{transform_indices = @transform_0, window_bounds = array<i64: 8, 32>}, {transform_indices = @transform_1, window_bounds = array<i64: 128, 32>}, {transform_indices = @transform_2, window_bounds = array<i64: 1, 128>}, {transform_indices = @transform_3, window_bounds = array<i64: 8, 1>}, {transform_indices = @transform_4, window_bounds = array<i64: 8, 128>}]} {
    %c0_i32 = arith.constant 0 : i32
    %0 = arith.cmpi eq, %arg1, %c0_i32 : i32
    %1 = arith.extui %0 : i1 to i32
    %c0_i32_0 = arith.constant 0 : i32
    %2 = arith.cmpi ne, %1, %c0_i32_0 : i32
    scf.if %2 {
      %cst_36 = arith.constant -1.000000e+30 : f32
      %76 = vector.broadcast %cst_36 : f32 to vector<8x1xf32>
      %c0_37 = arith.constant 0 : index
      %c0_38 = arith.constant 0 : index
      %77 = vector.load %arg7[%c0_37, %c0_38] : memref<8x1xf32, #tpu.memory_space<vmem>>, vector<8x1xf32>
      tpu.vector_store %arg7[%c0_37, %c0_38], %76 {strides = array<i32>} : memref<8x1xf32, #tpu.memory_space<vmem>>, vector<8x1xf32>,
      %cst_39 = arith.constant 0.000000e+00 : f32
      %78 = vector.broadcast %cst_39 : f32 to vector<8x1xf32>
      %c0_40 = arith.constant 0 : index
      %c0_41 = arith.constant 0 : index
      %79 = vector.load %arg8[%c0_40, %c0_41] : memref<8x1xf32, #tpu.memory_space<vmem>>, vector<8x1xf32>
      tpu.vector_store %arg8[%c0_40, %c0_41], %78 {strides = array<i32>} : memref<8x1xf32, #tpu.memory_space<vmem>>, vector<8x1xf32>,
      %cst_42 = arith.constant 0.000000e+00 : f32
      %80 = vector.broadcast %cst_42 : f32 to vector<8x1xf32>
      %c0_43 = arith.constant 0 : index
      %c0_44 = arith.constant 0 : index
      %81 = vector.load %arg9[%c0_43, %c0_44] : memref<8x1xf32, #tpu.memory_space<vmem>>, vector<8x1xf32>
      tpu.vector_store %arg9[%c0_43, %c0_44], %80 {strides = array<i32>} : memref<8x1xf32, #tpu.memory_space<vmem>>, vector<8x1xf32>,
    } else {
    }
    %c0 = arith.constant 0 : index
    %c0_1 = arith.constant 0 : index
    %3 = vector.load %arg2[%c0, %c0_1] : memref<8x32xbf16, #tpu.memory_space<vmem>>, vector<8x32xbf16>
    %c0_2 = arith.constant 0 : index
    %c0_3 = arith.constant 0 : index
    %4 = vector.load %arg3[%c0_2, %c0_3] : memref<128x32xbf16, #tpu.memory_space<vmem>>, vector<128x32xbf16>
    %cst = arith.constant dense<0.000000e+00> : vector<8x128xf32>
    %5 = tpu.matmul %3, %4, %cst {dimension_numbers = #tpu.dot_dimension_numbers<[1], [1], [0], [0], [0, 0, 1, 0], [], []>} : vector<8x32xbf16>, vector<128x32xbf16>, vector<8x128xf32> -> vector<8x128xf32>
    %c0_4 = arith.constant 0 : index
    %c0_5 = arith.constant 0 : index
    %6 = vector.load %arg5[%c0_4, %c0_5] : memref<8x1xi32, #tpu.memory_space<vmem>>, vector<8x1xi32>
    %c128_i32 = arith.constant 128 : i32
    %7 = arith.muli %arg1, %c128_i32 : i32
    %8 = vector.broadcast %7 : i32 to vector<8x1xi32>
    %9 = arith.cmpi sge, %6, %8 : vector<8x1xi32>
    %c128_i32_6 = arith.constant 128 : i32
    %10 = arith.addi %7, %c128_i32_6 : i32
    %11 = vector.broadcast %10 : i32 to vector<8x1xi32>
    %12 = arith.cmpi slt, %6, %11 : vector<8x1xi32>
    %13 = arith.andi %9, %12 : vector<8x1xi1>
    %14 = arith.extui %13 : vector<8x1xi1> to vector<8x1xi32>
    %15 = arith.sitofp %14 : vector<8x1xi32> to vector<8x1xf32>
    %16 = tpu.iota {dimensions = array<i32: 1>} : vector<8x128xi32>
    %17 = vector.broadcast %7 : i32 to vector<8x1xi32>
    %18 = arith.subi %6, %17 : vector<8x1xi32>
    %19 = vector.broadcast %18 : vector<8x1xi32> to vector<8x128xi32>
    %20 = arith.cmpi eq, %16, %19 : vector<8x128xi32>
    %cst_7 = arith.constant 0.000000e+00 : f32
    %21 = vector.broadcast %cst_7 : f32 to vector<8x128xf32>
    %22 = arith.select %20, %5, %21 : vector<8x128xi1>, vector<8x128xf32>
    %cst_8 = arith.constant dense<0.000000e+00> : vector<8xf32>
    %23 = vector.multi_reduction <add>, %22, %cst_8 [1] : vector<8x128xf32> to vector<8xf32>
    %24 = vector.shape_cast %23 : vector<8xf32> to vector<8x1xf32>
    %25 = arith.mulf %24, %24 : vector<8x1xf32>
    %cst_9 = arith.constant 1.000000e+00 : f32
    %26 = vector.broadcast %cst_9 : f32 to vector<8x1xf32>
    %27 = arith.subf %26, %25 : vector<8x1xf32>
    %cst_10 = arith.constant 0.000000e+00 : f32
    %cst_11 = arith.constant 1.000000e+00 : f32
    %28 = vector.broadcast %cst_10 : f32 to vector<8x1xf32>
    %29 = arith.maximumf %28, %27 : vector<8x1xf32>
    %30 = vector.broadcast %cst_11 : f32 to vector<8x1xf32>
    %31 = arith.minimumf %30, %29 : vector<8x1xf32>
    %32 = math.sqrt %31 : vector<8x1xf32>
    %cst_12 = arith.constant 0.87758255 : f32
    %33 = vector.broadcast %cst_12 : f32 to vector<8x1xf32>
    %34 = arith.mulf %24, %33 : vector<8x1xf32>
    %cst_13 = arith.constant 0.47942555 : f32
    %35 = vector.broadcast %cst_13 : f32 to vector<8x1xf32>
    %36 = arith.mulf %32, %35 : vector<8x1xf32>
    %37 = arith.subf %34, %36 : vector<8x1xf32>
    %cst_14 = arith.constant -0.87758255 : f32
    %38 = vector.broadcast %cst_14 : f32 to vector<8x1xf32>
    %39 = arith.cmpf ogt, %24, %38 : vector<8x1xf32>
    %cst_15 = arith.constant 0.239712775 : f32
    %40 = vector.broadcast %cst_15 : f32 to vector<8x1xf32>
    %41 = arith.subf %24, %40 : vector<8x1xf32>
    %42 = arith.select %39, %37, %41 : vector<8x1xi1>, vector<8x1xf32>
    %c0_16 = arith.constant 0 : index
    %c0_17 = arith.constant 0 : index
    %43 = vector.load %arg9[%c0_16, %c0_17] : memref<8x1xf32, #tpu.memory_space<vmem>>, vector<8x1xf32>
    %cst_18 = arith.constant 3.000000e+01 : f32
    %44 = vector.broadcast %cst_18 : f32 to vector<8x1xf32>
    %45 = arith.mulf %44, %42 : vector<8x1xf32>
    %46 = arith.mulf %15, %45 : vector<8x1xf32>
    %47 = arith.addf %43, %46 : vector<8x1xf32>
    %c0_19 = arith.constant 0 : index
    %c0_20 = arith.constant 0 : index
    %48 = vector.load %arg9[%c0_19, %c0_20] : memref<8x1xf32, #tpu.memory_space<vmem>>, vector<8x1xf32>
    tpu.vector_store %arg9[%c0_19, %c0_20], %47 {strides = array<i32>} : memref<8x1xf32, #tpu.memory_space<vmem>>, vector<8x1xf32>,
    %49 = vector.shape_cast %42 : vector<8x1xf32> to vector<8x1xf32>
    %50 = vector.broadcast %49 : vector<8x1xf32> to vector<8x128xf32>
    %51 = arith.select %20, %50, %5 : vector<8x128xi1>, vector<8x128xf32>
    %cst_21 = arith.constant 3.000000e+01 : f32
    %52 = vector.broadcast %cst_21 : f32 to vector<8x128xf32>
    %53 = arith.mulf %52, %51 : vector<8x128xf32>
    %c0_22 = arith.constant 0 : index
    %c0_23 = arith.constant 0 : index
    %54 = vector.load %arg4[%c0_22, %c0_23] : memref<1x128xf32, #tpu.memory_space<vmem>>, vector<1x128xf32>
    %55 = vector.broadcast %54 : vector<1x128xf32> to vector<8x128xf32>
    %56 = arith.addf %53, %55 : vector<8x128xf32>
    %c0_24 = arith.constant 0 : index
    %c0_25 = arith.constant 0 : index
    %57 = vector.load %arg7[%c0_24, %c0_25] : memref<8x1xf32, #tpu.memory_space<vmem>>, vector<8x1xf32>
    %cst_26 = arith.constant dense<0xFF800000> : vector<8xf32>
    %58 = vector.multi_reduction <maximumf>, %56, %cst_26 [1] : vector<8x128xf32> to vector<8xf32>
    %59 = vector.shape_cast %58 : vector<8xf32> to vector<8x1xf32>
    %60 = arith.maximumf %57, %59 : vector<8x1xf32>
    %c0_27 = arith.constant 0 : index
    %c0_28 = arith.constant 0 : index
    %61 = vector.load %arg8[%c0_27, %c0_28] : memref<8x1xf32, #tpu.memory_space<vmem>>, vector<8x1xf32>
    %62 = arith.subf %57, %60 : vector<8x1xf32>
    %63 = math.exp %62 : vector<8x1xf32>
    %64 = arith.mulf %61, %63 : vector<8x1xf32>
    %65 = vector.broadcast %60 : vector<8x1xf32> to vector<8x128xf32>
    %66 = arith.subf %56, %65 : vector<8x128xf32>
    %67 = math.exp %66 : vector<8x128xf32>
    %cst_29 = arith.constant dense<0.000000e+00> : vector<8xf32>
    %68 = vector.multi_reduction <add>, %67, %cst_29 [1] : vector<8x128xf32> to vector<8xf32>
    %69 = vector.shape_cast %68 : vector<8xf32> to vector<8x1xf32>
    %70 = arith.addf %64, %69 : vector<8x1xf32>
    %c0_30 = arith.constant 0 : index
    %c0_31 = arith.constant 0 : index
    %71 = vector.load %arg8[%c0_30, %c0_31] : memref<8x1xf32, #tpu.memory_space<vmem>>, vector<8x1xf32>
    tpu.vector_store %arg8[%c0_30, %c0_31], %70 {strides = array<i32>} : memref<8x1xf32, #tpu.memory_space<vmem>>, vector<8x1xf32>,
    %c0_32 = arith.constant 0 : index
    %c0_33 = arith.constant 0 : index
    %72 = vector.load %arg7[%c0_32, %c0_33] : memref<8x1xf32, #tpu.memory_space<vmem>>, vector<8x1xf32>
    tpu.vector_store %arg7[%c0_32, %c0_33], %60 {strides = array<i32>} : memref<8x1xf32, #tpu.memory_space<vmem>>, vector<8x1xf32>,
    %c0_i32_34 = arith.constant 0 : i32
    %73 = arith.cmpi eq, %arg1, %c0_i32_34 : i32
    %74 = arith.extui %73 : i1 to i32
    %c0_i32_35 = arith.constant 0 : i32
    %75 = arith.cmpi ne, %74, %c0_i32_35 : i32
    scf.if %75 {
      %c0_36 = arith.constant 0 : index
      %c0_37 = arith.constant 0 : index
      %76 = vector.load %arg7[%c0_36, %c0_37] : memref<8x1xf32, #tpu.memory_space<vmem>>, vector<8x1xf32>
      %c0_38 = arith.constant 0 : index
      %c0_39 = arith.constant 0 : index
      %77 = vector.load %arg8[%c0_38, %c0_39] : memref<8x1xf32, #tpu.memory_space<vmem>>, vector<8x1xf32>
      %78 = math.log %77 : vector<8x1xf32>
      %79 = arith.addf %76, %78 : vector<8x1xf32>
      %c0_40 = arith.constant 0 : index
      %c0_41 = arith.constant 0 : index
      %80 = vector.load %arg9[%c0_40, %c0_41] : memref<8x1xf32, #tpu.memory_space<vmem>>, vector<8x1xf32>
      %81 = arith.subf %79, %80 : vector<8x1xf32>
      %82 = vector.shape_cast %81 : vector<8x1xf32> to vector<8x1xf32>
      %83 = vector.broadcast %82 : vector<8x1xf32> to vector<8x128xf32>
      %c0_42 = arith.constant 0 : index
      %c0_43 = arith.constant 0 : index
      %84 = vector.load %arg6[%c0_42, %c0_43] : memref<8x128xf32, #tpu.memory_space<vmem>>, vector<8x128xf32>
      tpu.vector_store %arg6[%c0_42, %c0_43], %83 {strides = array<i32>} : memref<8x128xf32, #tpu.memory_space<vmem>>, vector<8x128xf32>,
    } else {
    }
    return
  }
  func.func @transform_0(%arg0: i32, %arg1: i32) -> (i32, i32) {
    %c0_i32 = arith.constant 0 : i32
    %c0_i32_0 = arith.constant 0 : i32
    return %arg0, %c0_i32 : i32, i32
  }
  func.func @transform_1(%arg0: i32, %arg1: i32) -> (i32, i32) {
    %c0_i32 = arith.constant 0 : i32
    %c0_i32_0 = arith.constant 0 : i32
    return %arg1, %c0_i32 : i32, i32
  }
  func.func @transform_2(%arg0: i32, %arg1: i32) -> (i32, i32) {
    %c0_i32 = arith.constant 0 : i32
    %c0_i32_0 = arith.constant 0 : i32
    return %c0_i32, %arg1 : i32, i32
  }
  func.func @transform_3(%arg0: i32, %arg1: i32) -> (i32, i32) {
    %c0_i32 = arith.constant 0 : i32
    %c0_i32_0 = arith.constant 0 : i32
    return %arg0, %c0_i32 : i32, i32
  }
  func.func @transform_4(%arg0: i32, %arg1: i32) -> (i32, i32) {
    %c0_i32 = arith.constant 0 : i32
    %c0_i32_0 = arith.constant 0 : i32
    return %arg0, %c0_i32 : i32, i32
  }
}

</mosaic_0001>

<bundles_post_ra>
// kernel: tpu_custom_call.1
= control target key start
LH: loop header
LB: loop body
LE: loop exit
PB: predicated region body
PF: predicated region fallthrough
CT: control target
= control target key end

     0   :  { %vm83_vm0 = vcmask 261120   ;;  %s400_s0 = inlined_call_operand.vmem [shape: bf16[8,32], index: 0, kind: input, shape index: {}]   ;;  %s401_s1 = inlined_call_operand.vmem [shape: bf16[128,32], index: 1, kind: input, shape index: {}]   ;;  %s402_s2 = inlined_call_operand.vmem [shape: f32[1,128], index: 2, kind: input, shape index: {}]   ;;  %s403_s3 = inlined_call_operand.vmem [shape: s32[8,1], index: 3, kind: input, shape index: {}]   ;;  %s404_s4 = inlined_call_operand.hbm [shape: f32[8,128], index: 4, kind: output, shape index: {}]  }
   0x1   :  { %v275_v0 = vld [vmem:[%s401_s1 + $0x38] sm:$0xff] }
   0x2   :  { %v109_v1 = vsel %vm83_vm0, %v275_v0, 0 }
   0x3   :  { %9 = vsyncpa [#allocation6], 0  ;;  %111 = vmatpush.bf16.xpose.msra.mxu0 %v109_v1  ;;  %v274_v2 = vld [vmem:[%s401_s1 + $0x30] sm:$0xff]  ;;  %v273_v4 = vld [vmem:[%s401_s1 + $0x28] sm:$0xff]  ;;  %vm22_vm1 = vcmask 7168   ;;  %v318_v11 = vmov 0   ;;  %v134_v21 = vlaneseq }
   0x4   :  { %v106_v3 = vsel %vm83_vm0, %v274_v2, 0  ;;  %v103_v5 = vsel %vm83_vm0, %v273_v4, 0  ;;  %v272_v6 = vld [vmem:[%s401_s1 + $0x20] sm:$0xff]  ;;  %v271_v8 = vld [vmem:[%s401_s1 + $0x18] sm:$0xff]  ;;  %280 = vset.pattern.permute.xlu0 %v318_v11  ;;  %v319_v12 = vmov 0.0   ;;  %v270_v13 = vld [vmem:[%s401_s1 + $0x10] sm:$0xff]  ;;  %281 = vset.pattern.permute.xlu1 %v318_v11 }
   0x5   :  { %v100_v7 = vsel %vm83_vm0, %v272_v6, 0  ;;  %v97_v9 = vsel %vm83_vm0, %v271_v8, 0  ;;  %v124_v10 = vld [vmem:[%s403_s3] sm:$0xff]  ;;  %24 = vst.msk [vmem:[#allocation3] sm:$0xff] %vm22_vm1, %v319_v12  ;;  %282 = vset.pattern.permute.xlu2 %v318_v11  ;;  %v94_v15 = vsel %vm83_vm0, %v270_v13, 0  ;;  %v269_v16 = vld [vmem:[%s401_s1 + $0x8] sm:$0xff] }
   0x6   :  { %vm127_vm2 = vcmp.ge.s32.totalorder %v124_v10, 0  ;;  %vm130_vm3 = vcmp.lt.s32.totalorder %v124_v10, 128  ;;  %138 = vperm.xlu0 %280, %v124_v10   ;;  %25 = vst.msk [vmem:[#allocation4] sm:$0xff] %vm22_vm1, %v319_v12  ;;  %v91_v17 = vsel %vm83_vm0, %v269_v16, 0  ;;  %v268_v18 = vld [vmem:[%s401_s1] sm:$0xff]  ;;  %v135_v22 = vand.u32 127, %v134_v21 }
   0x7   :  { %vm131_vm4 = vmand %vm127_vm2, %vm130_vm3  ;;  %v88_v19 = vsel %vm83_vm0, %v268_v18, 0  ;;  %v26_v20 = vld [vmem:[%s400_s0] sm:$0xf]  ;;  %v320_v55 = vmov -1e+30   ;;  %s224_s11 = sshll.u32 %s404_s4, 4  ;;  %s225_s11 = int_to_ptr.hbm [resolvable:$true] %s224_s11 }
   0x8   :  { %v266_v14 = vsel %vm131_vm4, 1.0, %v319_v12  ;;  %v283_v47 = vld [vmem:[%s402_s2] ss:$0 sm:$0xff]  ;;  %23 = vst.msk [vmem:[#allocation2] sm:$0xff] %vm22_vm1, %v320_v55  ;;  %s321_s2 = smov [#allocation5]  }
   0x9   :  { %s222_s8 = sshll.u32 %s321_s2, 4  ;;  %s223_s8 = int_to_ptr.vmem [resolvable:$true] %s222_s8 }
   0xb   :  { %112 = vmatpush.bf16.xpose.msra.mxu0 %v106_v3 }
   0xc   :  { %v183_v2 = vld [vmem:[#allocation3] sm:$0xff] }
   0xd   :  { %v166_v50 = vld [vmem:[#allocation4] sm:$0xff] }
   0xf   :  { %v179_v56 = vld [vmem:[#allocation2] sm:$0xff] }
  0x13   :  { %113 = vmatpush.bf16.xpose.msra.mxu0 %v103_v5 }
  0x1b   :  { %114 = vmatpush.bf16.xpose.msra.mxu0 %v100_v7 }
  0x23   :  { %115 = vmatpush.bf16.xpose.msra.mxu0 %v97_v9 }
  0x2b   :  { %116 = vmatpush.bf16.xpose.msra.mxu0 %v94_v15 }
  0x33   :  { %117 = vmatpush.bf16.xpose.msra.mxu0 %v91_v17 }
  0x3b   :  { %118 = vmatpush.bf16.xpose.msra.mxu0 %v88_v19 }
  0x42   :  { %265 = vmatmul.msk.bf16.vlgmr.msra.gmra.mxu0 %vm83_vm0, %v26_v20 }
  0x78   :  { %v139_v23 = vpop.permute.xlu0 %138 }
  0x79   :  { %vm140_vm5 = vcmp.eq.s32.totalorder %v135_v22, %v139_v23 }
  0xbf   :  { %v120_v24 = vpop.f32.mrf.mxu0 }
  0xc0   :  { %v141_v25 = vsel %vm140_vm5, %v120_v24, 0.0 }
  0xc1   :  { %142 = vadd.xlane.f32.xlu0 %v141_v25 }
  0xc7   :  { %v122_v26 = vpop.f32.mrf.mxu0 }
 0x134   :  { %v143_v27 = vpop.xlane.xlu0 %142 }
 0x135   :  { %v144_v28 = vmul.f32 %v143_v27, %v143_v27  ;;  %v160_v42 = vmul.f32 0.87758255, %v143_v27  ;;  %v267_v45 = vadd.f32 -0.23971277, %v143_v27  ;;  %vm163_vm8 = vcmp.gt.f32.partialorder %v143_v27, -0.87758255 }
 0x137   :  { %v145_v29 = vsub.f32 1.0, %v144_v28 }
 0x139   :  { %v146_v30 = vmax.f32 %v145_v29, 0.0 }
 0x13b   :  { %v147_v31 = vmin.f32 %v146_v30, 1.0 }
 0x13d   :  { %284 = vrsqrt.f32 %v147_v31  ;;  %vm155_vm6 = vcmp.eq.f32.partialorder %v147_v31, inf  ;;  %v158_v39 = vand.u32 2147483648, %v147_v31  ;;  %vm157_vm7 = vcmp.eq.f32.partialorder %v147_v31, 0.0 }
 0x143   :  { %v285_v32 = vpop.eup %284 }
 0x144   :  { %v149_v33 = vmul.f32 %v285_v32, %v147_v31 }
 0x146   :  { %v150_v34 = vmul.f32 %v285_v32, %v149_v33 }
 0x148   :  { %v151_v35 = vmul.f32 0.5, %v150_v34 }
 0x14a   :  { %v152_v36 = vsub.f32 1.5, %v151_v35 }
 0x14c   :  { %v153_v37 = vmul.f32 %v285_v32, %v152_v36 }
 0x14e   :  { %v154_v38 = vmul.f32 %v153_v37, %v147_v31 }
 0x150   :  { %v156_v40 = vsel %vm155_vm6, %v147_v31, %v154_v38 }
 0x151   :  { %v159_v41 = vsel %vm157_vm7, %v158_v39, %v156_v40 }
 0x152   :  { %v161_v43 = vmul.f32 0.47942555, %v159_v41 }
 0x154   :  { %v162_v44 = vsub.f32 %v160_v42, %v161_v43 }
 0x156   :  { %v165_v46 = vsel %vm163_vm8, %v162_v44, %v267_v45 }
 0x157   :  { %v167_v48 = vmul.f32 30.0, %v165_v46  ;;  %v172_v49 = vsel %vm140_vm5, %v165_v46, %v120_v24 }
 0x158   :  { %v173_v51 = vmul.f32 30.0, %v172_v49 }
 0x159   :  { %v168_v52 = vmul.f32 %v266_v14, %v167_v48 }
 0x15a   :  { %v178_v53 = vadd.f32 %v283_v47, %v173_v51 }
 0x15b   :  { %v169_v54 = vadd.f32 %v168_v52, %v166_v50 }
 0x15c   :  { %180 = vmax.xlane.f32.xlu1 %v178_v53 }
 0x15d   :  { %171 = vst.msk [vmem:[#allocation4] sm:$0xff] %vm22_vm1, %v169_v54 }
 0x164   :  { %v209_v11 = vld [vmem:[#allocation4] sm:$0xff] }
 0x1cf   :  { %v181_v57 = vpop.xlane.xlu1 %180 }
 0x1d0   :  { %v182_v58 = vmax.f32 %v179_v56, %v181_v57 }
 0x1d2   :  { %v184_v59 = vsub.f32 %v179_v56, %v182_v58  ;;  %200 = vst.msk [vmem:[#allocation2] sm:$0xff] %vm22_vm1, %v182_v58  ;;  %190 = vperm.xlu1 %281, %v182_v58  }
 0x1d4   :  { %v185_v0 = vmul.f32 1.442695, %v184_v59 }
 0x1d9   :  { %v204_v9 = vld [vmem:[#allocation2] sm:$0xff] }
 0x244   :  { %v191_v60 = vpop.permute.xlu1 %190 }
 0x245   :  { %v193_v61 = vsub.f32 %v178_v53, %v191_v60 }
 0x247   :  { %v194_v62 = vmul.f32 1.442695, %v193_v61 }
 0x249   :  { %286 = vpow2.f32 %v194_v62 }
 0x24a   :  { %288 = vpow2.f32 %v185_v0 }
 0x24f   :  { %v287_v63 = vpop.eup %286 }
 0x250   :  { %196 = vadd.xlane.f32.xlu2 %v287_v63  ;;  %v289_v1 = vpop.eup %288 }
 0x251   :  { %v187_v3 = vmul.f32 %v289_v1, %v183_v2 }
 0x2c3   :  { %v197_v4 = vpop.xlane.xlu2 %196 }
 0x2c4   :  { %v198_v5 = vadd.f32 %v197_v4, %v187_v3 }
 0x2c6   :  { %199 = vst.msk [vmem:[#allocation3] sm:$0xff] %vm22_vm1, %v198_v5 }
 0x2cd   :  { %v205_v6 = vld [vmem:[#allocation3] sm:$0xff] }
 0x2ce   :  { %290 = vlog2.f32 %v205_v6 }
 0x2d4   :  { %v291_v7 = vpop.eup %290 }
 0x2d5   :  { %v207_v8 = vmul.f32 0.6931472, %v291_v7 }
 0x2d7   :  { %v208_v10 = vadd.f32 %v207_v8, %v204_v9 }
 0x2d9   :  { %v210_v12 = vsub.f32 %v208_v10, %v209_v11 }
 0x2db   :  { %213 = vperm.xlu2 %282, %v210_v12  }
 0x335   :  { %v214_v13 = vpop.permute.xlu2 %213 }
 0x336   :  { %216 = vst [vmem:[#allocation5] sm:$0xff] %v214_v13 }
 0x337   :  { %227 = dma.vmem_to_hbm [thread:$0]  %s223_s8, 128, %s225_s11, [#allocation6]  }
 0x338   :  { %316 = dma.done.wait [#allocation6], 128  }
 0x339   :  { %317 = vsyncadd [#allocation6], 4294967168 }
 0x33a   :  { %232 = vsyncpa [#allocation6], 1 }

</bundles_post_ra>
